<compile_context>
chip_gen: v7x
topology: tpu7x:2x2x1
jax: 0.10.0
libtpu: 0.0.40
codegen_flags: <defaults>
</compile_context>

<pallas_src>
import functools

import jax
import jax.numpy as jnp
from jax import lax
from jax.experimental import pallas as pl
from jax.experimental.pallas import tpu as pltpu

_LANE = 128
_SUBLANE = 8


def _round_up(x, m):
    return -(-x // m) * m


def _mse_partial_kernel(a_ref, b_ref, out_ref, *, tile_rows, valid_rows,
                        mask_tail):
    """Per-tile partial sum of squared differences -> (8, 128) f32 block."""
    d = a_ref[...].astype(jnp.float32) - b_ref[...].astype(jnp.float32)
    dd = d * d
    if mask_tail:
        # Only the last (partial / OOB) tile actually needs this; it is a few
        # VPU ops per element and hides fully under the DMA in this
        # memory-bound kernel, so it is applied unconditionally when compiled.
        row = (pl.program_id(0) * tile_rows
               + lax.broadcasted_iota(jnp.int32, (tile_rows, _LANE), 0))
        dd = jnp.where(row < valid_rows, dd, jnp.float32(0.0))
    # (tile_rows, 128) -> (tile_rows//8, 8, 128) is layout-preserving (splits
    # whole (8,128) vregs); summing the leading axis is pure VPU vreg adds.
    # The expensive cross-lane reduction happens once, in the wrapper.
    out_ref[...] = jnp.sum(
        dd.reshape(tile_rows // _SUBLANE, _SUBLANE, _LANE), axis=0)


@functools.partial(jax.jit, static_argnames=("max_tile_rows",))
def outl_pixel_loss(outL, labels, *, max_tile_rows=4096):
    """Equivalent of outL_Pixel_LossFunc.forward: mean((outL - labels)**2)."""
    assert outL.shape == labels.shape, "outL and labels must share a shape"
    n = outL.size  # static (trace-time) element count

    a = outL.reshape(-1)     # contiguous reshape: free
    b = labels.reshape(-1)

    if n % _LANE != 0:
        # Rare fallback (image tensors almost always have n % 128 == 0); the
        # padded copy costs one extra pass over HBM but stays correct
        # (padding contributes 0 to the squared-difference sum).
        pad = _round_up(n, _LANE) - n
        a = jnp.pad(a, (0, pad))
        b = jnp.pad(b, (0, pad))

    rows = a.size // _LANE
    a2 = a.reshape(rows, _LANE)   # contiguous reshape: free
    b2 = b.reshape(rows, _LANE)

    # Tile selection: as big as allowed (amortize per-step overhead) but never
    # wider than the (8-rounded) slab; always a multiple of 8 sublanes.
    tile_rows = min(max(max_tile_rows, _SUBLANE), _round_up(rows, _SUBLANE))
    tile_rows = _round_up(tile_rows, _SUBLANE)
    num_tiles = pl.cdiv(rows, tile_rows)
    mask_tail = (rows % tile_rows) != 0   # last tile is partial / OOB

    kernel = functools.partial(
        _mse_partial_kernel,
        tile_rows=tile_rows,
        valid_rows=rows,
        mask_tail=mask_tail,
    )

    itemsize = jnp.dtype(outL.dtype).itemsize
    cost = pl.CostEstimate(
        flops=3 * n,              # sub, square, accumulate
        transcendentals=0,
        bytes_accessed=2 * n * itemsize + num_tiles * _SUBLANE * _LANE * 4,
    )

    partials = pl.pallas_call(
        kernel,
        out_shape=jax.ShapeDtypeStruct((num_tiles * _SUBLANE, _LANE),
                                       jnp.float32),
        grid_spec=pltpu.PrefetchScalarGridSpec(
            num_scalar_prefetch=0,
            grid=(num_tiles,),
            in_specs=[
                pl.BlockSpec((tile_rows, _LANE), lambda i: (i, 0)),
                pl.BlockSpec((tile_rows, _LANE), lambda i: (i, 0)),
            ],
            out_specs=pl.BlockSpec((_SUBLANE, _LANE), lambda i: (i, 0)),
        ),
        compiler_params=pltpu.CompilerParams(
            dimension_semantics=("parallel",),   # independent tiles -> megacore
        ),
        cost_estimate=cost,
    )(a2, b2)

    # nn.MSELoss(reduction='mean') divides by the total number of elements.
    ssq = jnp.sum(partials, dtype=jnp.float32)
    return (ssq / jnp.float32(n)).astype(jnp.float32)


if __name__ == "__main__":
    # Small shapes consistent with (S, B, C, H, W)
    S, B, C, H, W = 2, 2, 4, 16, 16
    key = jax.random.PRNGKey(0)
    k1, k2 = jax.random.split(key)
    outL = jax.random.uniform(k1, (S, B, C, H, W), dtype=jnp.float32)
    labels = jax.random.uniform(k2, (S, B, C, H, W), dtype=jnp.float32)

    loss = outl_pixel_loss(outL, labels)
    jax.block_until_ready(loss)

    # Sanity check against the pure-JAX reference of nn.MSELoss.
    ref = jnp.mean((outL - labels) ** 2)
    assert jnp.allclose(loss, ref, rtol=1e-5, atol=1e-6), (loss, ref)

    print("KERNEL_OK")
</pallas_src>

<mosaic_0001>
module attributes {stable_mosaic.version = 11 : i64} {
  func.func @_mse_partial_kernel(%arg0: i32, %arg1: memref<32x128xf32, #tpu.memory_space<vmem>>, %arg2: memref<32x128xf32, #tpu.memory_space<vmem>>, %arg3: memref<8x128xf32, #tpu.memory_space<vmem>>) attributes {dimension_semantics = [#tpu.dimension_semantics<parallel>], iteration_bounds = array<i64: 1>, scalar_prefetch = 0 : i64, scratch_operands = 0 : i64, tpu.core_type = #tpu.core_type<tc>, window_params = [{transform_indices = @transform_0, window_bounds = array<i64: 32, 128>}, {transform_indices = @transform_1, window_bounds = array<i64: 32, 128>}, {transform_indices = @transform_2, window_bounds = array<i64: 8, 128>}]} {
    %c0 = arith.constant 0 : index
    %c0_0 = arith.constant 0 : index
    %0 = vector.load %arg1[%c0, %c0_0] : memref<32x128xf32, #tpu.memory_space<vmem>>, vector<32x128xf32>
    %c0_1 = arith.constant 0 : index
    %c0_2 = arith.constant 0 : index
    %1 = vector.load %arg2[%c0_1, %c0_2] : memref<32x128xf32, #tpu.memory_space<vmem>>, vector<32x128xf32>
    %2 = arith.subf %0, %1 : vector<32x128xf32>
    %3 = arith.mulf %2, %2 : vector<32x128xf32>
    %4 = vector.shape_cast %3 : vector<32x128xf32> to vector<4x8x128xf32>
    %cst = arith.constant dense<0.000000e+00> : vector<8x128xf32>
    %5 = vector.multi_reduction <add>, %4, %cst [0] : vector<4x8x128xf32> to vector<8x128xf32>
    %c0_3 = arith.constant 0 : index
    %c0_4 = arith.constant 0 : index
    %6 = vector.load %arg3[%c0_3, %c0_4] : memref<8x128xf32, #tpu.memory_space<vmem>>, vector<8x128xf32>
    tpu.vector_store %arg3[%c0_3, %c0_4], %5 {strides = array<i32>} : memref<8x128xf32, #tpu.memory_space<vmem>>, vector<8x128xf32>,
    return
  }
  func.func @transform_0(%arg0: i32) -> (i32, i32) {
    %c0_i32 = arith.constant 0 : i32
    %c0_i32_0 = arith.constant 0 : i32
    return %arg0, %c0_i32 : i32, i32
  }
  func.func @transform_1(%arg0: i32) -> (i32, i32) {
    %c0_i32 = arith.constant 0 : i32
    %c0_i32_0 = arith.constant 0 : i32
    return %arg0, %c0_i32 : i32, i32
  }
  func.func @transform_2(%arg0: i32) -> (i32, i32) {
    %c0_i32 = arith.constant 0 : i32
    %c0_i32_0 = arith.constant 0 : i32
    return %arg0, %c0_i32 : i32, i32
  }
}

</mosaic_0001>

<bundles_post_ra>
// kernel: outl_pixel_loss.1
= control target key start
LH: loop header
LB: loop body
LE: loop exit
PB: predicated region body
PF: predicated region fallthrough
CT: control target
= control target key end

     0   :  { %s77_s0 = inlined_call_operand.vmem [shape: f32[32,128], index: 0, kind: input, shape index: {}]   ;;  %s78_s1 = inlined_call_operand.vmem [shape: f32[32,128], index: 1, kind: input, shape index: {}]   ;;  %s79_s2 = inlined_call_operand.vmem [shape: f32[8,128], index: 2, kind: output, shape index: {}]  }
   0x1   :  { %v11_v0 = vld [vmem:[%s77_s0] sm:$0xff]  ;;  %v12_v1 = vld [vmem:[%s77_s0 + $0x8] sm:$0xff]  ;;  %v13_v2 = vld [vmem:[%s77_s0 + $0x10] sm:$0xff] }
   0x2   :  { %v14_v3 = vld [vmem:[%s77_s0 + $0x18] sm:$0xff]  ;;  %v15_v4 = vld [vmem:[%s78_s1] sm:$0xff]  ;;  %v16_v5 = vld [vmem:[%s78_s1 + $0x8] sm:$0xff] }
   0x3   :  { %v17_v6 = vld [vmem:[%s78_s1 + $0x10] sm:$0xff]  ;;  %v18_v7 = vld [vmem:[%s78_s1 + $0x18] sm:$0xff]  ;;  %v19_v8 = vsub.f32 %v11_v0, %v15_v4  ;;  %v20_v9 = vsub.f32 %v12_v1, %v16_v5 }
   0x4   :  { %v21_v10 = vsub.f32 %v13_v2, %v17_v6  ;;  %v22_v11 = vsub.f32 %v14_v3, %v18_v7 }
   0x5   :  { %v23_v12 = vmul.f32 %v19_v8, %v19_v8  ;;  %v24_v13 = vmul.f32 %v20_v9, %v20_v9 }
   0x6   :  { %v25_v14 = vmul.f32 %v21_v10, %v21_v10  ;;  %v26_v15 = vmul.f32 %v22_v11, %v22_v11 }
   0x7   :  { %v27_v16 = vadd.f32 %v24_v13, %v23_v12 }
   0x9   :  { %v28_v17 = vadd.f32 %v27_v16, %v25_v14 }
   0xb   :  { %v29_v18 = vadd.f32 %v28_v17, %v26_v15 }
   0xd   :  { %30 = vst [vmem:[%s79_s2] sm:$0xff] %v29_v18 }

</bundles_post_ra>
